<compile_context>
chip_gen: v7x
topology: tpu7x:2x2x1
jax: 0.10.0
libtpu: 0.0.40
codegen_flags: <defaults>
</compile_context>

<pallas_src>
import numpy as np
import jax
import jax.numpy as jnp
from jax.experimental import pallas as pl
from jax.experimental.pallas import tpu as pltpu


# ---------------------------------------------------------------------------
# Weights (numpy at trace time, baked into the kernel as python floats)
# ---------------------------------------------------------------------------
def _gauss1d(kernlen, std=2.0):
    """1D gaussian identical to scipy.signal.gaussian(kernlen, std)."""
    n = np.arange(kernlen, dtype=np.float64) - (kernlen - 1) / 2.0
    return np.exp(-0.5 * (n / std) ** 2)


# g(v) = exp(-v^2/8): the integer-offset taps shared by the 3/5/7 gaussians.
_G = tuple(float(np.exp(-0.5 * (v / 2.0) ** 2)) for v in range(4))
# Per-size scale c_K / K^2 folded into the column pass.
_A3 = 0.7 / 9.0
_A5 = 0.2 / 25.0
_A7 = 0.1 / 49.0

_PAD_VALUE = -1.0e4  # sigmoid(-1e4) == 0.0 exactly in f32 -> zero halo


def combined_weight():
    """Fused 7x7 kernel (reference only)."""
    w = np.zeros((7, 7), dtype=np.float64)
    for K, c in ((3, 0.7), (5, 0.2), (7, 0.1)):
        g = _gauss1d(K)
        off = (7 - K) // 2
        w[off:off + K, off:off + K] += np.outer(g, g) / (K * K) * c
    return w.astype(np.float32)


# ---------------------------------------------------------------------------
# Pallas kernel
# ---------------------------------------------------------------------------
def _detection_kernel(x_ref, o_ref):
    # x_ref / o_ref: (TB*Hp8, Wpp) f32.  Images are stacked along sublanes
    # (Hp8 rows each, 3-row halo top/bottom) and lane-packed along lanes
    # (SW = W+6 columns per slot, 3-col halo left/right).  Halo positions hold
    # _PAD_VALUE, so after sigmoid they are exactly zero.
    s = jax.nn.sigmoid(x_ref[...])

    def pair(a, d, axis):
        # a shifted by +d plus a shifted by -d along `axis`.  Summing both
        # directions makes the result independent of the roll sign convention;
        # wrap-around only pollutes halo rows/cols that are never kept.
        n = a.shape[axis]
        return (pltpu.roll(a, shift=d, axis=axis) +
                pltpu.roll(a, shift=n - d, axis=axis))

    # ---- Row pass (lane axis): shared centered 1-D gaussian.  The 3/5-tap
    # ---- kernels nest inside the 7-tap one (g(0) == 1, so no center mul).
    r3 = s + _G[1] * pair(s, 1, 1)
    r5 = r3 + _G[2] * pair(s, 2, 1)
    r7 = r5 + _G[3] * pair(s, 3, 1)

    # ---- Column pass (sublane axis), regrouped by |row offset| so only 7
    # ---- terms (1 center + 3 symmetric pairs) are needed instead of 15.
    q7 = _A7 * r7
    q5 = _A5 * r5 + q7
    m0 = _A3 * r3 + q5          # |row offset| 0
    m1 = _G[1] * m0             # |row offset| 1  (all three kernels reach +-1)
    m2 = _G[2] * q5             # |row offset| 2  (5x5 and 7x7 only)
    m3 = _G[3] * q7             # |row offset| 3  (7x7 only)

    y = m0 + pair(m1, 1, 0) + pair(m2, 2, 0) + pair(m3, 3, 0)
    o_ref[...] = jnp.log1p(y)


# ---------------------------------------------------------------------------
# Wrapper
# ---------------------------------------------------------------------------
def _round_up(a, b):
    return (a + b - 1) // b * b


def detection_head(x):
    """x: [B, 1, H, W] float32 (NCHW, C == 1). Returns [B, 1, H, W] float32."""
    B, C, H, W = x.shape
    assert C == 1, "DetectionHead convs are 1-channel"
    x2 = x.reshape(B, H, W).astype(jnp.float32)

    # Lane packing: P images (each padded to SW = W+6 cols) per 128-lane group.
    SW = W + 6
    P = max(1, min(B, 128 // SW))        # SW > 128 -> P == 1
    G = -(-B // P)                       # number of lane-packed groups
    Hp8 = _round_up(H + 6, 8)            # rows per image incl. halo, sublane-aligned
    Wpp = _round_up(P * SW, 128)         # packed width, lane-aligned (lane-dense)

    # Groups per grid step: target ~2 MiB of input per step, bounded by VMEM.
    try:
        vmem_cap = int(pltpu.get_tpu_info().vmem_capacity_bytes)
    except Exception:
        vmem_cap = 64 << 20              # conservative fallback (v7x-sized)
    per_group = 4 * Hp8 * Wpp            # bytes of one group's block (in == out)
    live_factor = 12                     # 2x in + 2x out double buffers + ~8 temps
    tb_io = max(1, (2 << 20) // per_group)
    tb_vmem = max(1, (vmem_cap // 2) // (live_factor * per_group))
    TB = max(1, min(G, tb_io, tb_vmem))
    Gp = _round_up(G, TB)
    Bp = Gp * P
    # TODO(synk): H-strip tiling when a single group exceeds the VMEM budget
    #             (large feature maps on v7x's 64 MiB VMEM).

    # Pad + pack.  All pad/halo positions get _PAD_VALUE so that the in-kernel
    # sigmoid turns them into exact zeros (PyTorch zero-padding semantics).
    xp = jnp.pad(x2, ((0, Bp - B), (3, Hp8 - H - 3), (3, 3)),
                 constant_values=_PAD_VALUE)                       # (Bp, Hp8, SW)
    xp = xp.reshape(Gp, P, Hp8, SW).transpose(0, 2, 1, 3).reshape(Gp, Hp8, P * SW)
    xp = jnp.pad(xp, ((0, 0), (0, 0), (0, Wpp - P * SW)),
                 constant_values=_PAD_VALUE)                       # (Gp, Hp8, Wpp)
    xp = xp.reshape(Gp * Hp8, Wpp)

    rows_blk = TB * Hp8
    vmem_limit = int(min(max(32 << 20, live_factor * per_group * TB + (4 << 20)),
                         (vmem_cap * 3) // 4))

    out = pl.pallas_call(
        _detection_kernel,
        out_shape=jax.ShapeDtypeStruct((Gp * Hp8, Wpp), jnp.float32),
        grid_spec=pltpu.PrefetchScalarGridSpec(
            num_scalar_prefetch=0,
            grid=(Gp // TB,),
            in_specs=[pl.BlockSpec((rows_blk, Wpp), lambda b: (b, 0))],
            out_specs=pl.BlockSpec((rows_blk, Wpp), lambda b: (b, 0)),
        ),
        compiler_params=pltpu.CompilerParams(
            dimension_semantics=("parallel",),   # group chunks are independent
            vmem_limit_bytes=vmem_limit,
        ),
    )(xp)

    # Unpack: drop halo rows/cols, undo lane packing, crop batch padding.
    out = out.reshape(Gp, Hp8, Wpp)[:, 3:3 + H, :P * SW]   # (Gp, H, P*SW)
    out = out.reshape(Gp, H, P, SW)[:, :, :, 3:3 + W]      # (Gp, H, P, W)
    out = out.transpose(0, 2, 1, 3).reshape(Gp * P, H, W)[:B]
    return out.reshape(B, 1, H, W)


# ---------------------------------------------------------------------------
# Pure-JAX reference (same math as the PyTorch module)
# ---------------------------------------------------------------------------
def detection_head_reference(x):
    s = jax.nn.sigmoid(x.astype(jnp.float32))
    sp = jnp.pad(s, ((0, 0), (0, 0), (3, 3), (3, 3)))
    w = jnp.asarray(combined_weight()).reshape(1, 1, 7, 7)
    y = jax.lax.conv_general_dilated(
        sp, w, window_strides=(1, 1), padding="VALID",
        dimension_numbers=("NCHW", "OIHW", "NCHW"))
    return jnp.log(y + 1.0)


if __name__ == "__main__":
    key = jax.random.PRNGKey(0)
    det = jax.jit(detection_head)

    # Primary test shape (matches the module's 1-channel spec).
    B, C, H, W = 2, 1, 16, 16
    x = jax.random.normal(key, (B, C, H, W), dtype=jnp.float32)
    out = jax.block_until_ready(det(x))
    ref = jax.block_until_ready(detection_head_reference(x))
    assert out.shape == (B, C, H, W)
    o_np, r_np = np.asarray(out), np.asarray(ref)
    err = float(np.max(np.abs(o_np - r_np)))
    assert np.allclose(o_np, r_np, atol=1e-5, rtol=1e-5), (
        "mismatch vs reference: max abs err = %e" % err)

    # Secondary shape: exercises multi-slot lane packing, ragged batch and
    # sublane-stacked multi-group blocks.
    B2, H2, W2 = 5, 10, 20
    x2 = jax.random.normal(jax.random.PRNGKey(0), (B2, 1, H2, W2), dtype=jnp.float32)
    out2 = jax.block_until_ready(det(x2))
    ref2 = jax.block_until_ready(detection_head_reference(x2))
    o2, r2 = np.asarray(out2), np.asarray(ref2)
    err2 = float(np.max(np.abs(o2 - r2)))
    assert np.allclose(o2, r2, atol=1e-5, rtol=1e-5), (
        "mismatch vs reference (shape 2): max abs err = %e" % err2)

    print("KERNEL_OK")
</pallas_src>

<mosaic_0001>
module attributes {stable_mosaic.version = 11 : i64} {
  func.func @_detection_kernel(%arg0: i32, %arg1: memref<24x128xf32, #tpu.memory_space<vmem>>, %arg2: memref<24x128xf32, #tpu.memory_space<vmem>>) attributes {dimension_semantics = [#tpu.dimension_semantics<parallel>], iteration_bounds = array<i64: 1>, scalar_prefetch = 0 : i64, scratch_operands = 0 : i64, tpu.core_type = #tpu.core_type<tc>, window_params = [{transform_indices = @transform_0, window_bounds = array<i64: 24, 128>}, {transform_indices = @transform_1, window_bounds = array<i64: 24, 128>}]} {
    %c0 = arith.constant 0 : index
    %c0_0 = arith.constant 0 : index
    %0 = vector.load %arg1[%c0, %c0_0] : memref<24x128xf32, #tpu.memory_space<vmem>>, vector<24x128xf32>
    %1 = arith.negf %0 : vector<24x128xf32>
    %2 = math.exp %1 : vector<24x128xf32>
    %cst = arith.constant 1.000000e+00 : f32
    %3 = vector.broadcast %cst : f32 to vector<24x128xf32>
    %4 = arith.addf %3, %2 : vector<24x128xf32>
    %5 = arith.divf %3, %4 : vector<24x128xf32>
    %c1_i32 = arith.constant 1 : i32
    %6 = tpu.dynamic_rotate %5 by %c1_i32 dim 1 : vector<24x128xf32>, i32 -> vector<24x128xf32>
    %c127_i32 = arith.constant 127 : i32
    %7 = tpu.dynamic_rotate %5 by %c127_i32 dim 1 : vector<24x128xf32>, i32 -> vector<24x128xf32>
    %8 = arith.addf %6, %7 : vector<24x128xf32>
    %cst_1 = arith.constant 0.882496893 : f32
    %9 = vector.broadcast %cst_1 : f32 to vector<24x128xf32>
    %10 = arith.mulf %9, %8 : vector<24x128xf32>
    %11 = arith.addf %5, %10 : vector<24x128xf32>
    %c2_i32 = arith.constant 2 : i32
    %12 = tpu.dynamic_rotate %5 by %c2_i32 dim 1 : vector<24x128xf32>, i32 -> vector<24x128xf32>
    %c126_i32 = arith.constant 126 : i32
    %13 = tpu.dynamic_rotate %5 by %c126_i32 dim 1 : vector<24x128xf32>, i32 -> vector<24x128xf32>
    %14 = arith.addf %12, %13 : vector<24x128xf32>
    %cst_2 = arith.constant 0.606530666 : f32
    %15 = vector.broadcast %cst_2 : f32 to vector<24x128xf32>
    %16 = arith.mulf %15, %14 : vector<24x128xf32>
    %17 = arith.addf %11, %16 : vector<24x128xf32>
    %c3_i32 = arith.constant 3 : i32
    %18 = tpu.dynamic_rotate %5 by %c3_i32 dim 1 : vector<24x128xf32>, i32 -> vector<24x128xf32>
    %c125_i32 = arith.constant 125 : i32
    %19 = tpu.dynamic_rotate %5 by %c125_i32 dim 1 : vector<24x128xf32>, i32 -> vector<24x128xf32>
    %20 = arith.addf %18, %19 : vector<24x128xf32>
    %cst_3 = arith.constant 0.324652463 : f32
    %21 = vector.broadcast %cst_3 : f32 to vector<24x128xf32>
    %22 = arith.mulf %21, %20 : vector<24x128xf32>
    %23 = arith.addf %17, %22 : vector<24x128xf32>
    %cst_4 = arith.constant 0.00204081624 : f32
    %24 = vector.broadcast %cst_4 : f32 to vector<24x128xf32>
    %25 = arith.mulf %24, %23 : vector<24x128xf32>
    %cst_5 = arith.constant 8.000000e-03 : f32
    %26 = vector.broadcast %cst_5 : f32 to vector<24x128xf32>
    %27 = arith.mulf %26, %17 : vector<24x128xf32>
    %28 = arith.addf %27, %25 : vector<24x128xf32>
    %cst_6 = arith.constant 0.0777777805 : f32
    %29 = vector.broadcast %cst_6 : f32 to vector<24x128xf32>
    %30 = arith.mulf %29, %11 : vector<24x128xf32>
    %31 = arith.addf %30, %28 : vector<24x128xf32>
    %cst_7 = arith.constant 0.882496893 : f32
    %32 = vector.broadcast %cst_7 : f32 to vector<24x128xf32>
    %33 = arith.mulf %32, %31 : vector<24x128xf32>
    %cst_8 = arith.constant 0.606530666 : f32
    %34 = vector.broadcast %cst_8 : f32 to vector<24x128xf32>
    %35 = arith.mulf %34, %28 : vector<24x128xf32>
    %cst_9 = arith.constant 0.324652463 : f32
    %36 = vector.broadcast %cst_9 : f32 to vector<24x128xf32>
    %37 = arith.mulf %36, %25 : vector<24x128xf32>
    %c1_i32_10 = arith.constant 1 : i32
    %38 = tpu.dynamic_rotate %33 by %c1_i32_10 dim 0 : vector<24x128xf32>, i32 -> vector<24x128xf32>
    %c23_i32 = arith.constant 23 : i32
    %39 = tpu.dynamic_rotate %33 by %c23_i32 dim 0 : vector<24x128xf32>, i32 -> vector<24x128xf32>
    %40 = arith.addf %38, %39 : vector<24x128xf32>
    %41 = arith.addf %31, %40 : vector<24x128xf32>
    %c2_i32_11 = arith.constant 2 : i32
    %42 = tpu.dynamic_rotate %35 by %c2_i32_11 dim 0 : vector<24x128xf32>, i32 -> vector<24x128xf32>
    %c22_i32 = arith.constant 22 : i32
    %43 = tpu.dynamic_rotate %35 by %c22_i32 dim 0 : vector<24x128xf32>, i32 -> vector<24x128xf32>
    %44 = arith.addf %42, %43 : vector<24x128xf32>
    %45 = arith.addf %41, %44 : vector<24x128xf32>
    %c3_i32_12 = arith.constant 3 : i32
    %46 = tpu.dynamic_rotate %37 by %c3_i32_12 dim 0 : vector<24x128xf32>, i32 -> vector<24x128xf32>
    %c21_i32 = arith.constant 21 : i32
    %47 = tpu.dynamic_rotate %37 by %c21_i32 dim 0 : vector<24x128xf32>, i32 -> vector<24x128xf32>
    %48 = arith.addf %46, %47 : vector<24x128xf32>
    %49 = arith.addf %45, %48 : vector<24x128xf32>
    %50 = math.log1p %49 : vector<24x128xf32>
    %c0_13 = arith.constant 0 : index
    %c0_14 = arith.constant 0 : index
    %51 = vector.load %arg2[%c0_13, %c0_14] : memref<24x128xf32, #tpu.memory_space<vmem>>, vector<24x128xf32>
    tpu.vector_store %arg2[%c0_13, %c0_14], %50 {strides = array<i32>} : memref<24x128xf32, #tpu.memory_space<vmem>>, vector<24x128xf32>,
    return
  }
  func.func @transform_0(%arg0: i32) -> (i32, i32) {
    %c0_i32 = arith.constant 0 : i32
    %c0_i32_0 = arith.constant 0 : i32
    return %arg0, %c0_i32 : i32, i32
  }
  func.func @transform_1(%arg0: i32) -> (i32, i32) {
    %c0_i32 = arith.constant 0 : i32
    %c0_i32_0 = arith.constant 0 : i32
    return %arg0, %c0_i32 : i32, i32
  }
}

</mosaic_0001>

<bundles_post_ra>
// kernel: detection_head.1
= control target key start
LH: loop header
LB: loop body
LE: loop exit
PB: predicated region body
PF: predicated region fallthrough
CT: control target
= control target key end

     0   :  { %s239_s12 = smov 1   ;;  %s241_s13 = smov 2   ;;  %v119_v43 = vlaneseq  ;;  %s321_s0 = inlined_call_operand.vmem [shape: f32[24,128], index: 0, kind: input, shape index: {}]   ;;  %s322_s1 = inlined_call_operand.vmem [shape: f32[24,128], index: 1, kind: output, shape index: {}]  }
   0x1   :  { %v10_v0 = vld [vmem:[%s321_s0 + $0x10] sm:$0xff]  ;;  %v8_v1 = vld [vmem:[%s321_s0] sm:$0xff]  ;;  %v9_v2 = vld [vmem:[%s321_s0 + $0x8] sm:$0xff]  ;;  %s240_s0 = smov 127   ;;  %s242_s14 = smov 126  }
   0x2   :  { %v214_v3 = vmul.f32 -1.442695, %v10_v0  ;;  %v212_v4 = vmul.f32 -1.442695, %v8_v1  ;;  %v213_v5 = vmul.f32 -1.442695, %v9_v2 }
   0x3   :  { %s243_s15 = smov 3   ;;  %s244_s16 = smov 125   ;;  %v264_v54 = vshrl.u32 %v119_v43, 7 }
   0x4   :  { %221 = vpow2.f32 %v214_v3 }
   0x5   :  { %223 = vpow2.f32 %v212_v4  ;;  %vm141_vm0 = vcmp.lt.s32.totalorder %v264_v54, 2  ;;  %vm148_vm1 = vcmp.lt.s32.totalorder %v264_v54, 6  ;;  %vm161_vm2 = vcmp.lt.s32.totalorder %v264_v54, 3 }
   0x6   :  { %225 = vpow2.f32 %v213_v5  ;;  %vm168_vm3 = vcmp.lt.s32.totalorder %v264_v54, 5  ;;  %vm121_vm4 = vcmp.lt.s32.totalorder %v264_v54, 1  ;;  %vm128_vm5 = vcmp.lt.s32.totalorder %v264_v54, 7 }
   0xe   :  { %v222_v6 = vpop.eup %221 }
   0xf   :  { %v224_v7 = vpop.eup %223  ;;  %v22_v8 = vadd.f32 1.0, %v222_v6 }
  0x10   :  { %v226_v9 = vpop.eup %225  ;;  %v20_v10 = vadd.f32 1.0, %v224_v7 }
  0x11   :  { %227 = vrcp.f32 %v22_v8  ;;  %v21_v11 = vadd.f32 1.0, %v226_v9 }
  0x12   :  { %229 = vrcp.f32 %v20_v10 }
  0x13   :  { %231 = vrcp.f32 %v21_v11 }
  0x1b   :  { %v228_v12 = vpop.eup %227 }
  0x1c   :  { %v230_v13 = vpop.eup %229  ;;  %33 = vrot.lane.b32.xlu1 %v228_v12, %s239_s12 }
  0x1d   :  { %29 = vrot.lane.b32.xlu0 %v230_v13, %s239_s12  ;;  %v232_v14 = vpop.eup %231 }
  0x20   :  { %35 = vrot.lane.b32.xlu1 %v230_v13, %s240_s0 }
  0x21   :  { %31 = vrot.lane.b32.xlu0 %v232_v14, %s239_s12 }
  0x24   :  { %39 = vrot.lane.b32.xlu1 %v228_v12, %s240_s0 }
  0x25   :  { %37 = vrot.lane.b32.xlu0 %v232_v14, %s240_s0 }
  0x28   :  { %52 = vrot.lane.b32.xlu1 %v232_v14, %s241_s13 }
  0x29   :  { %50 = vrot.lane.b32.xlu0 %v230_v13, %s241_s13 }
  0x2c   :  { %56 = vrot.lane.b32.xlu1 %v230_v13, %s242_s14 }
  0x2d   :  { %54 = vrot.lane.b32.xlu0 %v228_v12, %s241_s13 }
  0x30   :  { %60 = vrot.lane.b32.xlu1 %v228_v12, %s242_s14 }
  0x31   :  { %58 = vrot.lane.b32.xlu0 %v232_v14, %s242_s14 }
  0x34   :  { %73 = vrot.lane.b32.xlu1 %v232_v14, %s243_s15 }
  0x35   :  { %71 = vrot.lane.b32.xlu0 %v230_v13, %s243_s15 }
  0x38   :  { %77 = vrot.lane.b32.xlu1 %v230_v13, %s244_s16 }
  0x39   :  { %75 = vrot.lane.b32.xlu0 %v228_v12, %s243_s15 }
  0x3c   :  { %81 = vrot.lane.b32.xlu1 %v228_v12, %s244_s16 }
  0x3d   :  { %79 = vrot.lane.b32.xlu0 %v232_v14, %s244_s16 }
  0x8e   :  { %v34_v15 = vpop.permute.xlu1 %33 }
  0x8f   :  { %v30_v16 = vpop.permute.xlu0 %29 }
  0x92   :  { %v36_v17 = vpop.permute.xlu1 %35 }
  0x93   :  { %v32_v18 = vpop.permute.xlu0 %31  ;;  %v41_v26 = vadd.f32 %v36_v17, %v30_v16 }
  0x95   :  { %v44_v30 = vmul.f32 0.8824969, %v41_v26 }
  0x96   :  { %v40_v19 = vpop.permute.xlu1 %39 }
  0x97   :  { %v38_v20 = vpop.permute.xlu0 %37  ;;  %v43_v31 = vadd.f32 %v40_v19, %v34_v15  ;;  %v47_v38 = vadd.f32 %v230_v13, %v44_v30 }
  0x98   :  { %v42_v33 = vadd.f32 %v38_v20, %v32_v18 }
  0x99   :  { %v46_v39 = vmul.f32 0.8824969, %v43_v31  ;;  %v101_v62 = vmul.f32 0.07777778, %v47_v38 }
  0x9a   :  { %v53_v21 = vpop.permute.xlu1 %52  ;;  %v45_v42 = vmul.f32 0.8824969, %v42_v33 }
  0x9b   :  { %v51_v22 = vpop.permute.xlu0 %50  ;;  %v49_v49 = vadd.f32 %v228_v12, %v46_v39 }
  0x9c   :  { %v48_v53 = vadd.f32 %v232_v14, %v45_v42 }
  0x9d   :  { %v103_v3 = vmul.f32 0.07777778, %v49_v49 }
  0x9e   :  { %v57_v23 = vpop.permute.xlu1 %56  ;;  %v102_v10 = vmul.f32 0.07777778, %v48_v53 }
  0x9f   :  { %v55_v24 = vpop.permute.xlu0 %54  ;;  %v62_v28 = vadd.f32 %v57_v23, %v51_v22 }
  0xa1   :  { %v65_v34 = vmul.f32 0.60653067, %v62_v28 }
  0xa2   :  { %v61_v25 = vpop.permute.xlu1 %60 }
  0xa3   :  { %v59_v27 = vpop.permute.xlu0 %58  ;;  %v64_v35 = vadd.f32 %v61_v25, %v55_v24  ;;  %v68_v44 = vadd.f32 %v65_v34, %v47_v38 }
  0xa4   :  { %v63_v36 = vadd.f32 %v59_v27, %v53_v21 }
  0xa5   :  { %v67_v45 = vmul.f32 0.60653067, %v64_v35  ;;  %v95_v56 = vmul.f32 0.008, %v68_v44 }
  0xa6   :  { %v74_v29 = vpop.permute.xlu1 %73  ;;  %v66_v47 = vmul.f32 0.60653067, %v63_v36 }
  0xa7   :  { %v72_v32 = vpop.permute.xlu0 %71  ;;  %v70_v57 = vadd.f32 %v67_v45, %v49_v49 }
  0xa8   :  { %v69_v60 = vadd.f32 %v66_v47, %v48_v53 }
  0xa9   :  { %v97_v4 = vmul.f32 0.008, %v70_v57 }
  0xaa   :  { %v78_v37 = vpop.permute.xlu1 %77  ;;  %v96_v7 = vmul.f32 0.008, %v69_v60 }
  0xab   :  { %v83_v40 = vadd.f32 %v78_v37, %v72_v32  ;;  %v76_v41 = vpop.permute.xlu0 %75 }
  0xad   :  { %v86_v46 = vmul.f32 0.32465246, %v83_v40 }
  0xae   :  { %v82_v48 = vpop.permute.xlu1 %81 }
  0xaf   :  { %v89_v50 = vadd.f32 %v86_v46, %v68_v44  ;;  %v85_v51 = vadd.f32 %v82_v48, %v76_v41  ;;  %v80_v52 = vpop.permute.xlu0 %79 }
  0xb0   :  { %v84_v55 = vadd.f32 %v80_v52, %v74_v29 }
  0xb1   :  { %v92_v58 = vmul.f32 0.0020408162, %v89_v50  ;;  %v88_v59 = vmul.f32 0.32465246, %v85_v51 }
  0xb2   :  { %v87_v61 = vmul.f32 0.32465246, %v84_v55 }
  0xb3   :  { %v98_v63 = vadd.f32 %v95_v56, %v92_v58  ;;  %v266_v0 = vmul.f32 0.32465246, %v92_v58  ;;  %v91_v1 = vadd.f32 %v88_v59, %v70_v57 }
  0xb4   :  { %v90_v2 = vadd.f32 %v87_v61, %v69_v60 }
  0xb5   :  { %v104_v5 = vadd.f32 %v101_v62, %v98_v63  ;;  %v110_v6 = vmul.f32 0.60653067, %v98_v63  ;;  %v94_v8 = vmul.f32 0.0020408162, %v91_v1  ;;  %v158_v12 = vrot.slane %v266_v0, 5 }
  0xb6   :  { %v93_v9 = vmul.f32 0.0020408162, %v90_v2  ;;  %v165_v13 = vrot.slane %v266_v0, 3 }
  0xb7   :  { %v107_v11 = vmul.f32 0.8824969, %v104_v5  ;;  %v100_v14 = vadd.f32 %v97_v4, %v94_v8  ;;  %v115_v15 = vmul.f32 0.32465246, %v94_v8  ;;  %v138_v20 = vrot.slane %v110_v6, 6 }
  0xb8   :  { %v99_v16 = vadd.f32 %v96_v7, %v93_v9  ;;  %v114_v17 = vmul.f32 0.32465246, %v93_v9  ;;  %v145_v21 = vrot.slane %v110_v6, 2 }
  0xb9   :  { %v116_v18 = vrot.slane %v107_v11, 7  ;;  %v125_v19 = vrot.slane %v107_v11, 1  ;;  %v106_v22 = vadd.f32 %v103_v3, %v100_v14  ;;  %v112_v23 = vmul.f32 0.60653067, %v100_v14 }
  0xba   :  { %v160_v24 = vrot.slane %v115_v15, 5  ;;  %v167_v25 = vrot.slane %v115_v15, 3  ;;  %v105_v26 = vadd.f32 %v102_v10, %v99_v16  ;;  %v111_v27 = vmul.f32 0.60653067, %v99_v16 }
  0xbb   :  { %v159_v28 = vrot.slane %v114_v17, 5  ;;  %v166_v29 = vrot.slane %v114_v17, 3  ;;  %v109_v30 = vmul.f32 0.8824969, %v106_v22  ;;  %v140_v31 = vrot.slane %v112_v23, 6 }
  0xbc   :  { %v147_v32 = vrot.slane %v112_v23, 2  ;;  %v164_v33 = vsel %vm161_vm2, %v160_v24, %v158_v12  ;;  %v171_v34 = vsel %vm168_vm3, %v167_v25, %v165_v13  ;;  %v108_v35 = vmul.f32 0.8824969, %v105_v26 }
  0xbd   :  { %v139_v36 = vrot.slane %v111_v27, 6  ;;  %v146_v37 = vrot.slane %v111_v27, 2  ;;  %v118_v38 = vrot.slane %v109_v30, 7  ;;  %v127_v39 = vrot.slane %v109_v30, 1 }
  0xbe   :  { %v144_v40 = vsel %vm141_vm0, %v140_v31, %v138_v20  ;;  %v151_v41 = vsel %vm148_vm1, %v147_v32, %v145_v21  ;;  %v117_v42 = vrot.slane %v108_v35, 7  ;;  %v126_v43 = vrot.slane %v108_v35, 1 }
  0xbf   :  { %v142_v44 = vsel %vm141_vm0, %v139_v36, %v140_v31  ;;  %v143_v45 = vsel %vm141_vm0, %v138_v20, %v139_v36  ;;  %v124_v46 = vsel %vm121_vm4, %v118_v38, %v116_v18  ;;  %v131_v47 = vsel %vm128_vm5, %v127_v39, %v125_v19 }
  0xc0   :  { %v149_v48 = vsel %vm148_vm1, %v146_v37, %v147_v32  ;;  %v150_v49 = vsel %vm148_vm1, %v145_v21, %v146_v37  ;;  %v122_v50 = vsel %vm121_vm4, %v117_v42, %v118_v38  ;;  %v123_v51 = vsel %vm121_vm4, %v116_v18, %v117_v42 }
  0xc1   :  { %v129_v52 = vsel %vm128_vm5, %v126_v43, %v127_v39  ;;  %v130_v53 = vsel %vm128_vm5, %v125_v19, %v126_v43  ;;  %v134_v57 = vadd.f32 %v131_v47, %v122_v50  ;;  %v152_v58 = vadd.f32 %v150_v49, %v144_v40 }
  0xc2   :  { %v132_v55 = vadd.f32 %v130_v53, %v124_v46  ;;  %v133_v56 = vadd.f32 %v129_v52, %v123_v51  ;;  %v153_v59 = vadd.f32 %v149_v48, %v143_v45  ;;  %v154_v60 = vadd.f32 %v151_v41, %v142_v44 }
  0xc3   :  { %v162_v61 = vsel %vm161_vm2, %v159_v28, %v160_v24  ;;  %v163_v62 = vsel %vm161_vm2, %v158_v12, %v159_v28  ;;  %v137_v1 = vadd.f32 %v134_v57, %v106_v22  ;;  %v169_v2 = vsel %vm168_vm3, %v166_v29, %v167_v25 }
  0xc4   :  { %v135_v63 = vadd.f32 %v132_v55, %v104_v5  ;;  %v136_v0 = vadd.f32 %v133_v56, %v105_v26  ;;  %v170_v3 = vsel %vm168_vm3, %v165_v13, %v166_v29  ;;  %v173_v4 = vadd.f32 %v169_v2, %v163_v62 }
  0xc5   :  { %v174_v6 = vadd.f32 %v171_v34, %v162_v61  ;;  %v157_v9 = vadd.f32 %v154_v60, %v137_v1  ;;  %v172_v10 = vadd.f32 %v170_v3, %v164_v33 }
  0xc6   :  { %v155_v7 = vadd.f32 %v152_v58, %v135_v63  ;;  %v156_v8 = vadd.f32 %v153_v59, %v136_v0 }
  0xc7   :  { %v177_v15 = vadd.f32 %v174_v6, %v157_v9 }
  0xc8   :  { %v175_v11 = vadd.f32 %v172_v10, %v155_v7  ;;  %v176_v14 = vadd.f32 %v173_v4, %v156_v8 }
  0xc9   :  { %v196_v5 = vadd.f32 1.0, %v177_v15  ;;  %v199_v19 = vmul.f32 -0.5, %v177_v15  ;;  %v202_v24 = vand.u32 2147483647, %v177_v15 }
  0xca   :  { %v178_v16 = vadd.f32 1.0, %v175_v11  ;;  %v187_v12 = vadd.f32 1.0, %v176_v14  ;;  %v181_v17 = vmul.f32 -0.5, %v175_v11  ;;  %v190_v18 = vmul.f32 -0.5, %v176_v14 }
  0xcb   :  { %v184_v13 = vand.u32 2147483647, %v175_v11  ;;  %v193_v21 = vand.u32 2147483647, %v176_v14  ;;  %v200_v22 = vadd.f32 1.0, %v199_v19 }
  0xcc   :  { %233 = vlog2.f32 %v178_v16  ;;  %v182_v54 = vadd.f32 1.0, %v181_v17  ;;  %v191_v20 = vadd.f32 1.0, %v190_v18  ;;  %vm203_vm8 = vcmp.lt.f32.partialorder %v202_v24, 0.0004427343 }
  0xcd   :  { %235 = vlog2.f32 %v187_v12  ;;  %vm185_vm6 = vcmp.lt.f32.partialorder %v184_v13, 0.0004427343  ;;  %vm194_vm7 = vcmp.lt.f32.partialorder %v193_v21, 0.0004427343  ;;  %v201_v33 = vmul.f32 %v200_v22, %v177_v15 }
  0xce   :  { %237 = vlog2.f32 %v196_v5  ;;  %v183_v27 = vmul.f32 %v182_v54, %v175_v11  ;;  %v192_v30 = vmul.f32 %v191_v20, %v176_v14 }
  0xd6   :  { %v234_v23 = vpop.eup %233 }
  0xd7   :  { %v236_v25 = vpop.eup %235  ;;  %v180_v26 = vmul.f32 0.6931472, %v234_v23 }
  0xd8   :  { %v238_v28 = vpop.eup %237  ;;  %v189_v29 = vmul.f32 0.6931472, %v236_v25 }
  0xd9   :  { %v186_v31 = vsel %vm185_vm6, %v183_v27, %v180_v26  ;;  %v198_v32 = vmul.f32 0.6931472, %v238_v28 }
  0xda   :  { %v195_v34 = vsel %vm194_vm7, %v192_v30, %v189_v29  ;;  %205 = vst [vmem:[%s322_s1] sm:$0xff] %v186_v31 }
  0xdb   :  { %v204_v35 = vsel %vm203_vm8, %v201_v33, %v198_v32  ;;  %206 = vst [vmem:[%s322_s1 + $0x8] sm:$0xff] %v195_v34 }
  0xdc   :  { %207 = vst [vmem:[%s322_s1 + $0x10] sm:$0xff] %v204_v35 }

</bundles_post_ra>
